<compile_context>
chip_gen: v7x
topology: tpu7x:2x2x1
jax: 0.10.0
libtpu: 0.0.40
codegen_flags: <defaults>
</compile_context>

<pallas_src>
import functools

import jax
import jax.numpy as jnp
from jax.experimental import pallas as pl
from jax.experimental.pallas import tpu as pltpu


# ----------------------------------------------------------------------------
# Fused attention kernel: one batch element per grid step, all heads inside.
# ----------------------------------------------------------------------------
def _fused_mha_kernel(x_ref, wqkv_ref, wo_ref, bo_ref, o_ref,
                      *, heads, dim_head, scale):
    # x_ref    : (N, D)        one batch element's activations
    # wqkv_ref : (D, 3*inner)  concatenated q|k|v projection (head-major cols)
    # wo_ref   : (inner, D)    output projection
    # bo_ref   : (1, D)        output-projection bias
    # o_ref    : (N, D)        output block
    inner = heads * dim_head

    x_bf = x_ref[...].astype(jnp.bfloat16)
    wqkv_bf = wqkv_ref[...].astype(jnp.bfloat16)

    # One fat QKV projection: (N, D) @ (D, 3*inner) -> (N, 3*inner), f32 acc.
    qkv = jnp.dot(x_bf, wqkv_bf, preferred_element_type=jnp.float32)

    # Per-head attention on static lane slices of the fused qkv tile.
    # heads is a small compile-time constant; static Python unroll is fine.
    ctx_parts = []
    for h in range(heads):
        lo = h * dim_head
        q_h = qkv[:, lo:lo + dim_head].astype(jnp.bfloat16)                 # (N, dh)
        k_h = qkv[:, inner + lo:inner + lo + dim_head].astype(jnp.bfloat16)  # (N, dh)
        v_h = qkv[:, 2 * inner + lo:2 * inner + lo + dim_head]               # (N, dh) f32

        # Scores: contract over dh directly (no materialized transpose of k).
        s = jax.lax.dot_general(q_h, k_h, (((1,), (1,)), ((), ())),
                                preferred_element_type=jnp.float32) * scale  # (N, N)

        # Numerically-stable softmax, all in f32 on the VPU/EUP.
        m = jnp.max(s, axis=-1, keepdims=True)
        p = jnp.exp(s - m)
        l = jnp.sum(p, axis=-1, keepdims=True)

        o_h = jnp.dot(p.astype(jnp.bfloat16), v_h.astype(jnp.bfloat16),
                      preferred_element_type=jnp.float32)                    # (N, dh)
        o_h = o_h * pl.reciprocal(l, approx=True)
        ctx_parts.append(o_h)

    # (N, inner) context, single fat output projection + bias epilogue.
    ctx = jnp.concatenate(ctx_parts, axis=-1)
    out = jnp.dot(ctx.astype(jnp.bfloat16), wo_ref[...].astype(jnp.bfloat16),
                  preferred_element_type=jnp.float32)                        # (N, D)
    o_ref[...] = out + bo_ref[...]


# ----------------------------------------------------------------------------
# Forward wrapper: weights arrive pre-laid-out; grid is just (B,).
# ----------------------------------------------------------------------------
def attention_forward(x, wqkv_t, wo_t, bo, *, heads, dim_head):
    """x: (B, N, D); wqkv_t: (D, 3*inner); wo_t: (inner, D); bo: (1, D)."""
    B, N, D = x.shape
    inner = heads * dim_head
    assert wqkv_t.shape == (D, 3 * inner)
    assert wo_t.shape == (inner, D)
    assert bo.shape == (1, D)
    scale = dim_head ** -0.5

    kernel = functools.partial(_fused_mha_kernel,
                               heads=heads, dim_head=dim_head, scale=scale)
    return pl.pallas_call(
        kernel,
        out_shape=jax.ShapeDtypeStruct((B, N, D), jnp.float32),
        grid_spec=pltpu.PrefetchScalarGridSpec(
            num_scalar_prefetch=0,
            grid=(B,),
            in_specs=[
                pl.BlockSpec((None, N, D), lambda b: (b, 0, 0)),
                pl.BlockSpec((D, 3 * inner), lambda b: (0, 0)),
                pl.BlockSpec((inner, D), lambda b: (0, 0)),
                pl.BlockSpec((1, D), lambda b: (0, 0)),
            ],
            out_specs=pl.BlockSpec((None, N, D), lambda b: (b, 0, 0)),
        ),
        compiler_params=pltpu.CompilerParams(
            dimension_semantics=("parallel",)),
    )(x, wqkv_t, wo_t, bo)


# ----------------------------------------------------------------------------
# Deterministic parameter init (PyTorch nn.Linear layout & defaults).
# ----------------------------------------------------------------------------
def init_attention_params(key, dim, heads, dim_head):
    inner = heads * dim_head
    k1, k2, k3 = jax.random.split(key, 3)
    b_qkv = 1.0 / (dim ** 0.5)
    w_qkv = jax.random.uniform(k1, (3 * inner, dim), jnp.float32, -b_qkv, b_qkv)
    b_o = 1.0 / (inner ** 0.5)
    w_out = jax.random.uniform(k2, (dim, inner), jnp.float32, -b_o, b_o)
    b_out = jax.random.uniform(k3, (dim,), jnp.float32, -b_o, b_o)
    return w_qkv, w_out, b_out


def prepare_attention_params(w_qkv, w_out, b_out):
    """One-time layout plumbing (hoisted off the forward hot path).

    PyTorch Linear stores (out_features, in_features); a single transpose
    gives kernel-ready (D, 3*inner) / (inner, D) tensors whose column/row
    ordering already matches chunk(3) + head-major slicing.
    """
    wqkv_t = jnp.transpose(w_qkv)          # (D, 3*inner)
    wo_t = jnp.transpose(w_out)            # (inner, D)
    bo = b_out.reshape(1, -1)              # (1, D)
    return wqkv_t, wo_t, bo


# ----------------------------------------------------------------------------
# Pure-JAX reference (matches the PyTorch forward) for a sanity check.
# ----------------------------------------------------------------------------
def ref_attention(x, w_qkv, w_out, b_out, heads, dim_head):
    B, N, D = x.shape
    inner = heads * dim_head
    scale = dim_head ** -0.5
    qkv = x @ w_qkv.T                                    # (B, N, 3*inner)
    q, k, v = jnp.split(qkv, 3, axis=-1)

    def split_heads(t):
        return jnp.transpose(t.reshape(B, N, heads, dim_head), (0, 2, 1, 3))

    q, k, v = map(split_heads, (q, k, v))                # (B, H, N, dh)
    dots = jnp.einsum('bhnd,bhmd->bhnm', q, k) * scale
    attn = jax.nn.softmax(dots, axis=-1)
    out = jnp.einsum('bhnm,bhmd->bhnd', attn, v)
    out = jnp.transpose(out, (0, 2, 1, 3)).reshape(B, N, inner)
    return out @ w_out.T + b_out


if __name__ == "__main__":
    key = jax.random.PRNGKey(0)
    kx, kp = jax.random.split(key)

    B, N, dim, heads, dim_head = 2, 8, 32, 4, 16
    x = jax.random.normal(kx, (B, N, dim), jnp.float32)
    w_qkv, w_out, b_out = init_attention_params(kp, dim, heads, dim_head)
    wqkv_t, wo_t, bo = prepare_attention_params(w_qkv, w_out, b_out)

    out = attention_forward(x, wqkv_t, wo_t, bo, heads=heads, dim_head=dim_head)
    out = jax.block_until_ready(out)
    assert out.shape == (B, N, dim), out.shape

    ref = jax.block_until_ready(
        ref_attention(x, w_qkv, w_out, b_out, heads, dim_head))
    assert jnp.allclose(out, ref, atol=2e-2, rtol=2e-2), \
        f"max abs diff = {jnp.max(jnp.abs(out - ref))}"

    print("KERNEL_OK")
</pallas_src>

<mosaic_0001>
module attributes {stable_mosaic.version = 11 : i64} {
  func.func @_fused_mha_kernel(%arg0: i32, %arg1: memref<1x8x32xf32, #tpu.memory_space<vmem>>, %arg2: memref<32x192xf32, #tpu.memory_space<vmem>>, %arg3: memref<64x32xf32, #tpu.memory_space<vmem>>, %arg4: memref<1x32xf32, #tpu.memory_space<vmem>>, %arg5: memref<1x8x32xf32, #tpu.memory_space<vmem>>) attributes {dimension_semantics = [#tpu.dimension_semantics<parallel>], iteration_bounds = array<i64: 2>, scalar_prefetch = 0 : i64, scratch_operands = 0 : i64, tpu.core_type = #tpu.core_type<tc>, window_params = [{transform_indices = @transform_0, window_bounds = array<i64: 1, 8, 32>}, {pipeline_mode = #tpu.pipeline_mode<synchronous>, transform_indices = @transform_1, window_bounds = array<i64: 32, 192>}, {pipeline_mode = #tpu.pipeline_mode<synchronous>, transform_indices = @transform_2, window_bounds = array<i64: 64, 32>}, {pipeline_mode = #tpu.pipeline_mode<synchronous>, transform_indices = @transform_3, window_bounds = array<i64: 1, 32>}, {transform_indices = @transform_4, window_bounds = array<i64: 1, 8, 32>}]} {
    %c0 = arith.constant 0 : index
    %c0_0 = arith.constant 0 : index
    %c0_1 = arith.constant 0 : index
    %0 = vector.load %arg1[%c0, %c0_0, %c0_1] : memref<1x8x32xf32, #tpu.memory_space<vmem>>, vector<1x8x32xf32>
    %1 = vector.shape_cast %0 : vector<1x8x32xf32> to vector<8x32xf32>
    %2 = arith.truncf %1 : vector<8x32xf32> to vector<8x32xbf16>
    %c0_2 = arith.constant 0 : index
    %c0_3 = arith.constant 0 : index
    %3 = vector.load %arg2[%c0_2, %c0_3] : memref<32x192xf32, #tpu.memory_space<vmem>>, vector<32x192xf32>
    %4 = arith.truncf %3 : vector<32x192xf32> to vector<32x192xbf16>
    %cst = arith.constant dense<0.000000e+00> : vector<8x192xf32>
    %5 = tpu.matmul %2, %4, %cst {dimension_numbers = #tpu.dot_dimension_numbers<[1], [0], [0], [1], [0, 0, 1, 1], [], []>} : vector<8x32xbf16>, vector<32x192xbf16>, vector<8x192xf32> -> vector<8x192xf32>
    %6 = vector.extract_strided_slice %5 {offsets = [0, 0], sizes = [8, 16], strides = [1, 1]} : vector<8x192xf32> to vector<8x16xf32>
    %7 = arith.truncf %6 : vector<8x16xf32> to vector<8x16xbf16>
    %8 = vector.extract_strided_slice %5 {offsets = [0, 64], sizes = [8, 16], strides = [1, 1]} : vector<8x192xf32> to vector<8x16xf32>
    %9 = arith.truncf %8 : vector<8x16xf32> to vector<8x16xbf16>
    %10 = vector.extract_strided_slice %5 {offsets = [0, 128], sizes = [8, 16], strides = [1, 1]} : vector<8x192xf32> to vector<8x16xf32>
    %cst_4 = arith.constant dense<0.000000e+00> : vector<8x8xf32>
    %11 = tpu.matmul %7, %9, %cst_4 {dimension_numbers = #tpu.dot_dimension_numbers<[1], [1], [0], [0], [0, 0, 1, 0], [], []>} : vector<8x16xbf16>, vector<8x16xbf16>, vector<8x8xf32> -> vector<8x8xf32>
    %cst_5 = arith.constant 2.500000e-01 : f32
    %12 = vector.broadcast %cst_5 : f32 to vector<8x8xf32>
    %13 = arith.mulf %11, %12 : vector<8x8xf32>
    %cst_6 = arith.constant dense<0xFF800000> : vector<8xf32>
    %14 = vector.multi_reduction <maximumf>, %13, %cst_6 [1] : vector<8x8xf32> to vector<8xf32>
    %15 = vector.shape_cast %14 : vector<8xf32> to vector<8x1xf32>
    %16 = vector.broadcast %15 : vector<8x1xf32> to vector<8x8xf32>
    %17 = arith.subf %13, %16 : vector<8x8xf32>
    %18 = math.exp %17 : vector<8x8xf32>
    %cst_7 = arith.constant dense<0.000000e+00> : vector<8xf32>
    %19 = vector.multi_reduction <add>, %18, %cst_7 [1] : vector<8x8xf32> to vector<8xf32>
    %20 = vector.shape_cast %19 : vector<8xf32> to vector<8x1xf32>
    %21 = arith.truncf %18 : vector<8x8xf32> to vector<8x8xbf16>
    %22 = arith.truncf %10 : vector<8x16xf32> to vector<8x16xbf16>
    %cst_8 = arith.constant dense<0.000000e+00> : vector<8x16xf32>
    %23 = tpu.matmul %21, %22, %cst_8 {dimension_numbers = #tpu.dot_dimension_numbers<[1], [0], [0], [1], [0, 0, 1, 1], [], []>} : vector<8x8xbf16>, vector<8x16xbf16>, vector<8x16xf32> -> vector<8x16xf32>
    %24 = tpu.reciprocal %20 {approx = true} : vector<8x1xf32> -> vector<8x1xf32>
    %25 = vector.broadcast %24 : vector<8x1xf32> to vector<8x16xf32>
    %26 = arith.mulf %23, %25 : vector<8x16xf32>
    %27 = vector.extract_strided_slice %5 {offsets = [0, 16], sizes = [8, 16], strides = [1, 1]} : vector<8x192xf32> to vector<8x16xf32>
    %28 = arith.truncf %27 : vector<8x16xf32> to vector<8x16xbf16>
    %29 = vector.extract_strided_slice %5 {offsets = [0, 80], sizes = [8, 16], strides = [1, 1]} : vector<8x192xf32> to vector<8x16xf32>
    %30 = arith.truncf %29 : vector<8x16xf32> to vector<8x16xbf16>
    %31 = vector.extract_strided_slice %5 {offsets = [0, 144], sizes = [8, 16], strides = [1, 1]} : vector<8x192xf32> to vector<8x16xf32>
    %cst_9 = arith.constant dense<0.000000e+00> : vector<8x8xf32>
    %32 = tpu.matmul %28, %30, %cst_9 {dimension_numbers = #tpu.dot_dimension_numbers<[1], [1], [0], [0], [0, 0, 1, 0], [], []>} : vector<8x16xbf16>, vector<8x16xbf16>, vector<8x8xf32> -> vector<8x8xf32>
    %cst_10 = arith.constant 2.500000e-01 : f32
    %33 = vector.broadcast %cst_10 : f32 to vector<8x8xf32>
    %34 = arith.mulf %32, %33 : vector<8x8xf32>
    %cst_11 = arith.constant dense<0xFF800000> : vector<8xf32>
    %35 = vector.multi_reduction <maximumf>, %34, %cst_11 [1] : vector<8x8xf32> to vector<8xf32>
    %36 = vector.shape_cast %35 : vector<8xf32> to vector<8x1xf32>
    %37 = vector.broadcast %36 : vector<8x1xf32> to vector<8x8xf32>
    %38 = arith.subf %34, %37 : vector<8x8xf32>
    %39 = math.exp %38 : vector<8x8xf32>
    %cst_12 = arith.constant dense<0.000000e+00> : vector<8xf32>
    %40 = vector.multi_reduction <add>, %39, %cst_12 [1] : vector<8x8xf32> to vector<8xf32>
    %41 = vector.shape_cast %40 : vector<8xf32> to vector<8x1xf32>
    %42 = arith.truncf %39 : vector<8x8xf32> to vector<8x8xbf16>
    %43 = arith.truncf %31 : vector<8x16xf32> to vector<8x16xbf16>
    %cst_13 = arith.constant dense<0.000000e+00> : vector<8x16xf32>
    %44 = tpu.matmul %42, %43, %cst_13 {dimension_numbers = #tpu.dot_dimension_numbers<[1], [0], [0], [1], [0, 0, 1, 1], [], []>} : vector<8x8xbf16>, vector<8x16xbf16>, vector<8x16xf32> -> vector<8x16xf32>
    %45 = tpu.reciprocal %41 {approx = true} : vector<8x1xf32> -> vector<8x1xf32>
    %46 = vector.broadcast %45 : vector<8x1xf32> to vector<8x16xf32>
    %47 = arith.mulf %44, %46 : vector<8x16xf32>
    %48 = vector.extract_strided_slice %5 {offsets = [0, 32], sizes = [8, 16], strides = [1, 1]} : vector<8x192xf32> to vector<8x16xf32>
    %49 = arith.truncf %48 : vector<8x16xf32> to vector<8x16xbf16>
    %50 = vector.extract_strided_slice %5 {offsets = [0, 96], sizes = [8, 16], strides = [1, 1]} : vector<8x192xf32> to vector<8x16xf32>
    %51 = arith.truncf %50 : vector<8x16xf32> to vector<8x16xbf16>
    %52 = vector.extract_strided_slice %5 {offsets = [0, 160], sizes = [8, 16], strides = [1, 1]} : vector<8x192xf32> to vector<8x16xf32>
    %cst_14 = arith.constant dense<0.000000e+00> : vector<8x8xf32>
    %53 = tpu.matmul %49, %51, %cst_14 {dimension_numbers = #tpu.dot_dimension_numbers<[1], [1], [0], [0], [0, 0, 1, 0], [], []>} : vector<8x16xbf16>, vector<8x16xbf16>, vector<8x8xf32> -> vector<8x8xf32>
    %cst_15 = arith.constant 2.500000e-01 : f32
    %54 = vector.broadcast %cst_15 : f32 to vector<8x8xf32>
    %55 = arith.mulf %53, %54 : vector<8x8xf32>
    %cst_16 = arith.constant dense<0xFF800000> : vector<8xf32>
    %56 = vector.multi_reduction <maximumf>, %55, %cst_16 [1] : vector<8x8xf32> to vector<8xf32>
    %57 = vector.shape_cast %56 : vector<8xf32> to vector<8x1xf32>
    %58 = vector.broadcast %57 : vector<8x1xf32> to vector<8x8xf32>
    %59 = arith.subf %55, %58 : vector<8x8xf32>
    %60 = math.exp %59 : vector<8x8xf32>
    %cst_17 = arith.constant dense<0.000000e+00> : vector<8xf32>
    %61 = vector.multi_reduction <add>, %60, %cst_17 [1] : vector<8x8xf32> to vector<8xf32>
    %62 = vector.shape_cast %61 : vector<8xf32> to vector<8x1xf32>
    %63 = arith.truncf %60 : vector<8x8xf32> to vector<8x8xbf16>
    %64 = arith.truncf %52 : vector<8x16xf32> to vector<8x16xbf16>
    %cst_18 = arith.constant dense<0.000000e+00> : vector<8x16xf32>
    %65 = tpu.matmul %63, %64, %cst_18 {dimension_numbers = #tpu.dot_dimension_numbers<[1], [0], [0], [1], [0, 0, 1, 1], [], []>} : vector<8x8xbf16>, vector<8x16xbf16>, vector<8x16xf32> -> vector<8x16xf32>
    %66 = tpu.reciprocal %62 {approx = true} : vector<8x1xf32> -> vector<8x1xf32>
    %67 = vector.broadcast %66 : vector<8x1xf32> to vector<8x16xf32>
    %68 = arith.mulf %65, %67 : vector<8x16xf32>
    %69 = vector.extract_strided_slice %5 {offsets = [0, 48], sizes = [8, 16], strides = [1, 1]} : vector<8x192xf32> to vector<8x16xf32>
    %70 = arith.truncf %69 : vector<8x16xf32> to vector<8x16xbf16>
    %71 = vector.extract_strided_slice %5 {offsets = [0, 112], sizes = [8, 16], strides = [1, 1]} : vector<8x192xf32> to vector<8x16xf32>
    %72 = arith.truncf %71 : vector<8x16xf32> to vector<8x16xbf16>
    %73 = vector.extract_strided_slice %5 {offsets = [0, 176], sizes = [8, 16], strides = [1, 1]} : vector<8x192xf32> to vector<8x16xf32>
    %cst_19 = arith.constant dense<0.000000e+00> : vector<8x8xf32>
    %74 = tpu.matmul %70, %72, %cst_19 {dimension_numbers = #tpu.dot_dimension_numbers<[1], [1], [0], [0], [0, 0, 1, 0], [], []>} : vector<8x16xbf16>, vector<8x16xbf16>, vector<8x8xf32> -> vector<8x8xf32>
    %cst_20 = arith.constant 2.500000e-01 : f32
    %75 = vector.broadcast %cst_20 : f32 to vector<8x8xf32>
    %76 = arith.mulf %74, %75 : vector<8x8xf32>
    %cst_21 = arith.constant dense<0xFF800000> : vector<8xf32>
    %77 = vector.multi_reduction <maximumf>, %76, %cst_21 [1] : vector<8x8xf32> to vector<8xf32>
    %78 = vector.shape_cast %77 : vector<8xf32> to vector<8x1xf32>
    %79 = vector.broadcast %78 : vector<8x1xf32> to vector<8x8xf32>
    %80 = arith.subf %76, %79 : vector<8x8xf32>
    %81 = math.exp %80 : vector<8x8xf32>
    %cst_22 = arith.constant dense<0.000000e+00> : vector<8xf32>
    %82 = vector.multi_reduction <add>, %81, %cst_22 [1] : vector<8x8xf32> to vector<8xf32>
    %83 = vector.shape_cast %82 : vector<8xf32> to vector<8x1xf32>
    %84 = arith.truncf %81 : vector<8x8xf32> to vector<8x8xbf16>
    %85 = arith.truncf %73 : vector<8x16xf32> to vector<8x16xbf16>
    %cst_23 = arith.constant dense<0.000000e+00> : vector<8x16xf32>
    %86 = tpu.matmul %84, %85, %cst_23 {dimension_numbers = #tpu.dot_dimension_numbers<[1], [0], [0], [1], [0, 0, 1, 1], [], []>} : vector<8x8xbf16>, vector<8x16xbf16>, vector<8x16xf32> -> vector<8x16xf32>
    %87 = tpu.reciprocal %83 {approx = true} : vector<8x1xf32> -> vector<8x1xf32>
    %88 = vector.broadcast %87 : vector<8x1xf32> to vector<8x16xf32>
    %89 = arith.mulf %86, %88 : vector<8x16xf32>
    %90 = tpu.concatenate %26, %47, %68, %89 in 1 : vector<8x16xf32>, vector<8x16xf32>, vector<8x16xf32>, vector<8x16xf32> -> vector<8x64xf32>
    %91 = arith.truncf %90 : vector<8x64xf32> to vector<8x64xbf16>
    %c0_24 = arith.constant 0 : index
    %c0_25 = arith.constant 0 : index
    %92 = vector.load %arg3[%c0_24, %c0_25] : memref<64x32xf32, #tpu.memory_space<vmem>>, vector<64x32xf32>
    %93 = arith.truncf %92 : vector<64x32xf32> to vector<64x32xbf16>
    %cst_26 = arith.constant dense<0.000000e+00> : vector<8x32xf32>
    %94 = tpu.matmul %91, %93, %cst_26 {dimension_numbers = #tpu.dot_dimension_numbers<[1], [0], [0], [1], [0, 0, 1, 1], [], []>} : vector<8x64xbf16>, vector<64x32xbf16>, vector<8x32xf32> -> vector<8x32xf32>
    %c0_27 = arith.constant 0 : index
    %c0_28 = arith.constant 0 : index
    %95 = vector.load %arg4[%c0_27, %c0_28] : memref<1x32xf32, #tpu.memory_space<vmem>>, vector<1x32xf32>
    %96 = vector.broadcast %95 : vector<1x32xf32> to vector<8x32xf32>
    %97 = arith.addf %94, %96 : vector<8x32xf32>
    %c0_29 = arith.constant 0 : index
    %c0_30 = arith.constant 0 : index
    %c0_31 = arith.constant 0 : index
    %98 = vector.load %arg5[%c0_29, %c0_30, %c0_31] : memref<1x8x32xf32, #tpu.memory_space<vmem>>, vector<1x8x32xf32>
    %99 = vector.shape_cast %98 : vector<1x8x32xf32> to vector<8x32xf32>
    %100 = vector.shape_cast %97 : vector<8x32xf32> to vector<1x8x32xf32>
    tpu.vector_store %arg5[%c0_29, %c0_30, %c0_31], %100 {strides = array<i32>} : memref<1x8x32xf32, #tpu.memory_space<vmem>>, vector<1x8x32xf32>,
    return
  }
  func.func @transform_0(%arg0: i32) -> (i32, i32, i32) {
    %c0_i32 = arith.constant 0 : i32
    %c0_i32_0 = arith.constant 0 : i32
    %c0_i32_1 = arith.constant 0 : i32
    return %arg0, %c0_i32, %c0_i32_0 : i32, i32, i32
  }
  func.func @transform_1(%arg0: i32) -> (i32, i32) {
    %c0_i32 = arith.constant 0 : i32
    %c0_i32_0 = arith.constant 0 : i32
    %c0_i32_1 = arith.constant 0 : i32
    return %c0_i32, %c0_i32_0 : i32, i32
  }
  func.func @transform_2(%arg0: i32) -> (i32, i32) {
    %c0_i32 = arith.constant 0 : i32
    %c0_i32_0 = arith.constant 0 : i32
    %c0_i32_1 = arith.constant 0 : i32
    return %c0_i32, %c0_i32_0 : i32, i32
  }
  func.func @transform_3(%arg0: i32) -> (i32, i32) {
    %c0_i32 = arith.constant 0 : i32
    %c0_i32_0 = arith.constant 0 : i32
    %c0_i32_1 = arith.constant 0 : i32
    return %c0_i32, %c0_i32_0 : i32, i32
  }
  func.func @transform_4(%arg0: i32) -> (i32, i32, i32) {
    %c0_i32 = arith.constant 0 : i32
    %c0_i32_0 = arith.constant 0 : i32
    %c0_i32_1 = arith.constant 0 : i32
    return %arg0, %c0_i32, %c0_i32_0 : i32, i32, i32
  }
}

</mosaic_0001>

<bundles_post_ra>
// kernel: tpu_custom_call.1
= control target key start
LH: loop header
LB: loop body
LE: loop exit
PB: predicated region body
PF: predicated region fallthrough
CT: control target
= control target key end

     0   :  { %9 = vsyncpa [#allocation3], 0  ;;  %s1348_s0 = inlined_call_operand.vmem [shape: f32[2,8,32], index: 0, kind: input, shape index: {}]   ;;  %s1349_s1 = inlined_call_operand.vmem [shape: f32[32,192], index: 1, kind: input, shape index: {}]   ;;  %s1350_s2 = inlined_call_operand.vmem [shape: f32[64,32], index: 2, kind: input, shape index: {}]   ;;  %s1351_s3 = inlined_call_operand.vmem [shape: f32[1,32], index: 3, kind: input, shape index: {}]   ;;  %s1352_s4 = inlined_call_operand.hbm [shape: f32[2,8,32], index: 4, kind: output, shape index: {}]  }
   0x1   :  { %11 = vsyncpa [#allocation3 + $0x1], 0  ;;  %s1121_s15 = smov 0   ;;  %s1123_s16 = smov 0  }
   0x2   :  { %s1125_s17 = smov 0   ;;  %s1127_s18 = smov 0  }
   0x3 LB: > { %s1142_s19 = sadd.s32 4294967295, %s1083_s18   ;;  %s854_s20 = sadd.s32 4294967294, %s1083_s18   ;;  %s1083_s18 = sphi %s1127_s18, %s1358_s18   ;;  %s1079_s17 = sphi %s1125_s17, %s1357_s17   ;;  %s1075_s16 = sphi %s1123_s16, %s1356_s16   ;;  %s1071_s15 = sphi %s1121_s15, %s1355_s15  }
   0x4   : > { %s1146_s21 = sadd.s32 1, %s1083_s18   ;;  %s113_s22 = sadd.s32 1, %s1079_s17 }
   0x5   : > { %s110_s23 = ssub.s32 %s1083_s18, %s1146_s21  ;;  %p123_p0 = scmp.ne.s32.totalorder %s1079_s17, %s1075_s16 }
   0x6   : > { %p111_p1 = scmp.eq.s32.totalorder %s110_s23, 0  ;;  %p124_p2 = scmp.eq.s32.totalorder %s1142_s19, 1 }
   0x7   : > { %p129_p3 = scmp.ne.s32.totalorder %s1075_s16, %s1071_s15  ;;  %p130_p4 = scmp.eq.s32.totalorder %s854_s20, 1 }
   0x8   : > { %s1157_s24 = scalar_select %p111_p1, %s1079_s17, %s113_s22  }
   0x9   : > { %p1159_p5 = por %p124_p2, %p123_p0  ;;  %p1163_p6 = por %p130_p4, %p129_p3 }
   0xa   : > { %p857_p7 = scmp.ge.s32.totalorder %s1083_s18, 1  ;;  %p164_p8 = scmp.lt.s32.totalorder %s1083_s18, 3 }
   0xc   : > { %p165_p9 = pnand %p857_p7, %p164_p8 }
   0xd   : > { %v197_v0 = vld [vmem:[%s1349_s1 + $0x8] sm:$0xff] (!%p165_p9)  ;;  %v199_v1 = vld [vmem:[%s1349_s1 + $0x18] sm:$0xff] (!%p165_p9)  ;;  %v196_v2 = vld [vmem:[%s1349_s1] sm:$0xff] (!%p165_p9)  ;;  %p189_p10 = scmp.lt.s32.totalorder (!%p165_p9), %s1142_s19, 1  ;;  %v1085_v7 = vmov (!%p165_p9), 0   ;;  %vm208_vm0 = vcmask (!%p165_p9), 261120  }
   0xe   : > { %168 = sbr.rel (%p165_p9) target bundleno = 1352 (0x548), region = 36  ;;  %v205_v3 = vpack.c.bf16 (!%p165_p9), %v199_v1, %v197_v0  ;;  %v198_v4 = vld [vmem:[%s1349_s1 + $0x10] sm:$0xff] (!%p165_p9)  ;;  %v201_v5 = vld [vmem:[%s1349_s1 + $0x28] sm:$0xff] (!%p165_p9)  ;;  %v203_v6 = vld [vmem:[%s1349_s1 + $0x38] sm:$0xff] (!%p165_p9)  ;;  %244 = vmatprep.mubr.bf16.mxu0 (!%p165_p9), %v1085_v7  ;;  %v1086_v15 = vmov (!%p165_p9), 0.0   ;;  %vm1087_vm1 = vmmov (!%p165_p9), 0  }
   0xf   : > { %v204_v8 = vpack.c.bf16 (!%p165_p9), %v198_v4, %v196_v2  ;;  %v207_v9 = vpack.c.bf16 (!%p165_p9), %v203_v6, %v201_v5  ;;  %v200_v10 = vld [vmem:[%s1349_s1 + $0x20] sm:$0xff] (!%p165_p9)  ;;  %v202_v11 = vld [vmem:[%s1349_s1 + $0x30] sm:$0xff] (!%p165_p9)  ;;  %896 = vmatprep.subr.bf16.mxu1 (!%p165_p9), %v1086_v15  ;;  %898 = vmatprep.mubr.msk.bf16.mxu1 (!%p165_p9), %vm1087_vm1, %v1086_v15  ;;  %vm320_vm2 = vcmask (!%p165_p9), 1043456   ;;  %s1088_s5 = smov (!%p165_p9), 112   ;;  %s1089_s6 = smov (!%p165_p9), 64   ;;  %vm257_vm3 = vcmask (!%p165_p9), 130048  }
  0x10   : > { %212 = vmatprep.subr.bf16.mxu0 (!%p165_p9), %v205_v3  ;;  %v206_v12 = vpack.c.bf16 (!%p165_p9), %v202_v11, %v200_v10  ;;  %s1090_s7 = smov (!%p165_p9), 32   ;;  %s1091_s8 = smov (!%p165_p9), 48   ;;  %vm305_vm4 = vcmask (!%p165_p9), 64512   ;;  %vm714_vm5 = vcmask (!%p165_p9), 392192   ;;  %vm736_vm6 = vcmask (!%p165_p9), 523264  }
  0x11   : > { %213 = vmatpush1.bf16.msra.mxu0 (!%p165_p9), %v204_v8  ;;  %s1092_s9 = smov (!%p165_p9), 16   ;;  %s1093_s10 = smov (!%p165_p9), 96  }
  0x12   : > { %214 = vmatprep.subr.bf16.mxu0 (!%p165_p9), %v207_v9  ;;  %s1094_s11 = smov (!%p165_p9), 80   ;;  %s872_s20 = sshll.u32 (!%p165_p9), %s1142_s19, 7 }
  0x13   : > { %s1305_s29 = scalar_lea.hbm (!%p165_p9), %s1352_s4, %s872_s20 }
  0x15   : > { %s190_s23 = scalar_select %p189_p10, %s1142_s19, 1  ;;  %215 = vmatpush1.bf16.msra.mxu0 %v206_v12 }
  0x16   : > { %902 = vmatprep.subr.bf16.mxu0 %v1086_v15 }
  0x17   : > { %s859_s27 = sshll.u32 %s190_s23, 3 }
  0x18   : > { %s192_s30 = scalar_lea.vmem %s1348_s0, %s859_s27 }
  0x19   : > { %v194_v13 = vld [vmem:[%s192_s30] sm:$0xff] }
  0x1a   : > { %v195_v14 = vpack.c.bf16 %v194_v13, %v194_v13 }
  0x1c   : > { %860 = vmatmul.mubr.msk.bf16.vlgmr.msra.gmra.mrb[0].mxu0 %vm208_vm0, %v195_v14 }
  0x1d   : > { %904 = vmatprep.mubr.msk.bf16.mxu0 %vm1087_vm1, %v1086_v15 }
  0xef   : > { %v246_v16 = vpop.f32.mrb[0].mxu0 }
  0xf0   : > { %v253_v17 = vpack.c.bf16 %v246_v16, %v246_v16  ;;  %v248_v18 = vpop.f32.mrb[1].mxu0 }
  0xf1   : > { %v1205_v19 = vpack.c.bf16 %v248_v18, %v248_v18  ;;  %v250_v20 = vpop.f32.mrb[2].mxu0 }
  0xf2   : > { %366 = vrot.lane.b32.xlu1 %v253_v17, %s1088_s5  ;;  %255 = vrot.lane.b32.xlu0 %v253_v17, %s1089_s6  ;;  %v251_v21 = vpop.f32.mrb[3].mxu0 }
  0xf3   : > { %v322_v22 = vsel %vm320_vm2, %v1205_v19, 0 }
  0xf4   : > { %903 = vmatpush3.bf16.msra.mxu0 %v322_v22 }
  0xf5   : > { %914 = vmatprep.subr.bf16.mxu0 %v1086_v15 }
  0xf6   : > { %480 = vrot.lane.b32.xlu1 %v253_v17, %s1090_s7  ;;  %368 = vrot.lane.b32.xlu0 %v253_v17, %s1091_s8 }
  0xfa   : > { %591 = vrot.lane.b32.xlu1 %v253_v17, %s1092_s9  ;;  %478 = vrot.lane.b32.xlu0 %v253_v17, %s1093_s10 }
  0xfe   : > { %589 = vrot.lane.b32.xlu0 %v253_v17, %s1094_s11 }
 0x164   : > { %v256_v23 = vpop.permute.xlu0 %255  ;;  %v367_v26 = vpop.permute.xlu1 %366 }
 0x165   : > { %v262_v24 = vsel %vm257_vm3, %v256_v23, 0 }
 0x166   : > { %897 = vmatpush3.bf16.xpose.msra.mxu1 %v262_v24 }
 0x167   : > { %908 = vmatprep.subr.bf16.mxu1 %v1086_v15 }
 0x168   : > { %v369_v25 = vpop.permute.xlu0 %368  ;;  %v481_v28 = vpop.permute.xlu1 %480 }
 0x169   : > { %v374_v27 = vsel %vm257_vm3, %v369_v25, 0  ;;  %v486_v29 = vsel %vm257_vm3, %v481_v28, 0 }
 0x16c   : > { %v592_v30 = vpop.permute.xlu1 %591  ;;  %v479_v31 = vpop.permute.xlu0 %478 }
 0x16d   : > { %899 = vmatmul.mubr.msk.bf16.vlgmr.msra.gmra.mrb[0].mxu1 %vm257_vm3, %v253_v17  ;;  %v597_v32 = vsel %vm257_vm3, %v592_v30, 0 }
 0x16e   : > { %909 = vmatpush3.bf16.xpose.msra.mxu1 %v374_v27  ;;  %910 = vmatprep.mubr.msk.bf16.mxu1 %vm1087_vm1, %v1086_v15 }
 0x16f   : > { %920 = vmatprep.subr.bf16.mxu1 %v1086_v15 }
 0x170   : > { %v590_v33 = vpop.permute.xlu0 %589 }
 0x175   : > { %911 = vmatmul.mubr.msk.bf16.vlgmr.msra.gmra.mrb[4].mxu1 %vm257_vm3, %v367_v26 }
 0x176   : > { %921 = vmatpush3.bf16.xpose.msra.mxu1 %v486_v29  ;;  %922 = vmatprep.mubr.msk.bf16.mxu1 %vm1087_vm1, %v1086_v15 }
 0x177   : > { %932 = vmatprep.subr.bf16.mxu1 %v1086_v15 }
 0x17d   : > { %923 = vmatmul.mubr.msk.bf16.vlgmr.msra.gmra.mrb[8].mxu1 %vm257_vm3, %v479_v31  ;;  %v717_v31 = vld [vmem:[%s1350_s2] sm:$0xff] }
 0x17e   : > { %933 = vmatpush3.bf16.xpose.msra.mxu1 %v597_v32  ;;  %934 = vmatprep.mubr.msk.bf16.mxu1 %vm1087_vm1, %v1086_v15  ;;  %v718_v32 = vld [vmem:[%s1350_s2 + $0x8] sm:$0xff] }
 0x17f   : > { %944 = vmatprep.subr.bf16.mxu1 %v1086_v15 }
 0x185   : > { %935 = vmatmul.mubr.msk.bf16.vlgmr.msra.gmra.mrb[12].mxu1 %vm257_vm3, %v590_v33  ;;  %v719_v33 = vld [vmem:[%s1350_s2 + $0x10] sm:$0xff] }
 0x186   : > { %952 = vmatprep.mubr.msk.bf16.mxu1 %vm1087_vm1, %v1086_v15 }
 0x240   : > { %v298_v34 = vpop.f32.mrb[0].mxu1 }
 0x241   : > { %v304_v35 = vmul.f32 0.25, %v298_v34  ;;  %v900_v36 = vpop.f32.mrb[1].mxu1  ;;  %v725_v34 = vpack.c.bf16 %v718_v32, %v717_v31 }
 0x242   : > { %v301_v37 = vpop.f32.mrb[2].mxu1 }
 0x243   : > { %v901_v38 = vpop.f32.mrb[3].mxu1  ;;  %v306_v39 = vsel %vm305_vm4, %v304_v35, -inf  ;;  %945 = vmatpush3.bf16.msra.mxu1 %v725_v34 }
 0x244   : > { %307 = vmax.xlane.f32.xlu1 %v306_v39  ;;  %946 = vmatprep.subr.bf16.mxu1 %v1086_v15 }
 0x248   : > { %v410_v40 = vpop.f32.mrb[4].mxu1 }
 0x249   : > { %v416_v41 = vmul.f32 0.25, %v410_v40  ;;  %v912_v42 = vpop.f32.mrb[5].mxu1 }
 0x24a   : > { %v413_v43 = vpop.f32.mrb[6].mxu1  ;;  %v721_v42 = vld [vmem:[%s1350_s2 + $0x20] sm:$0xff] }
 0x24b   : > { %v913_v44 = vpop.f32.mrb[7].mxu1  ;;  %v417_v45 = vsel %vm305_vm4, %v416_v41, -inf  ;;  %v722_v43 = vld [vmem:[%s1350_s2 + $0x28] sm:$0xff] }
 0x24c   : > { %418 = vmax.xlane.f32.xlu0 %v417_v45  ;;  %v727_v45 = vpack.c.bf16 %v722_v43, %v721_v42 }
 0x250   : > { %v522_v46 = vpop.f32.mrb[8].mxu1 }
 0x251   : > { %v528_v47 = vmul.f32 0.25, %v522_v46  ;;  %v924_v48 = vpop.f32.mrb[9].mxu1 }
 0x252   : > { %v525_v49 = vpop.f32.mrb[10].mxu1 }
 0x253   : > { %v925_v50 = vpop.f32.mrb[11].mxu1  ;;  %v529_v51 = vsel %vm305_vm4, %v528_v47, -inf }
 0x254   : > { %530 = vmax.xlane.f32.xlu0 %v529_v51 }
 0x255   : > { %539 = vrot.lane.b32.xlu1 %v1205_v19, %s1093_s10 }
 0x258   : > { %v633_v52 = vpop.f32.mrb[12].mxu1 }
 0x259   : > { %v936_v53 = vpop.f32.mrb[13].mxu1  ;;  %v639_v56 = vmul.f32 0.25, %v633_v52 }
 0x25a   : > { %v636_v54 = vpop.f32.mrb[14].mxu1  ;;  %v723_v53 = vld [vmem:[%s1350_s2 + $0x30] sm:$0xff] }
 0x25b   : > { %v937_v55 = vpop.f32.mrb[15].mxu1  ;;  %v640_v57 = vsel %vm305_vm4, %v639_v56, -inf  ;;  %v724_v54 = vld [vmem:[%s1350_s2 + $0x38] sm:$0xff] }
 0x25c   : > { %v728_v55 = vpack.c.bf16 %v724_v54, %v723_v53 }
 0x26a   : > { %428 = vrot.lane.b32.xlu0 %v1205_v19, %s1088_s5  ;;  %s1095_s5 = smov [#allocation2]  }
 0x26b   : > { %s1025_s6 = sshll.u32 %s1095_s5, 4  ;;  %s1026_s6 = int_to_ptr.vmem [resolvable:$false] %s1025_s6 }
 0x26c   : > { %s1027_s10 = scalar_lea.vmem %s1026_s6, 256 }
 0x279   : > { %641 = vmax.xlane.f32.xlu1 %v640_v57 }
 0x28a   : > { %650 = vrot.lane.b32.xlu1 %v1205_v19, %s1094_s11 }
 0x2d1   : > { %v308_v58 = vpop.xlane.xlu1 %307 }
 0x2d2   : > { %v309_v59 = vsub.f32 %v304_v35, %v308_v58  ;;  %v720_v35 = vld [vmem:[%s1350_s2 + $0x18] sm:$0xff] }
 0x2d3   : > { %v726_v40 = vpack.c.bf16 %v720_v35, %v719_v33 }
 0x2d4   : > { %v310_v60 = vmul.f32 1.442695, %v309_v59 }
 0x2d5   : > { %v540_v8 = vpop.permute.xlu1 %539  ;;  %947 = vmatpush3.bf16.msra.mxu1 %v726_v40 }
 0x2d6   : > { %1005 = vpow2.f32 %v310_v60  ;;  %v545_v11 = vsel %vm320_vm2, %v540_v8, 0  ;;  %948 = vmatprep.subr.bf16.mxu1 %v1086_v15 }
 0x2d9   : > { %v419_v61 = vpop.xlane.xlu0 %418  ;;  %949 = vmatpush3.bf16.msra.mxu1 %v727_v45 }
 0x2da   : > { %v420_v62 = vsub.f32 %v416_v41, %v419_v61  ;;  %950 = vmatprep.subr.bf16.mxu1 %v1086_v15 }
 0x2dc   : > { %v421_v63 = vmul.f32 1.442695, %v420_v62 }
 0x2dd   : > { %951 = vmatpush3.bf16.msra.mxu1 %v728_v55 }
 0x2de   : > { %1007 = vpow2.f32 %v421_v63 }
 0x2e0   : > { %v1006_v0 = vpop.eup %1005 }
 0x2e1   : > { %v531_v1 = vpop.xlane.xlu0 %530  ;;  %v315_v2 = vpack.c.bf16 %v1006_v0, %v1006_v0  ;;  %v312_v24 = vsel %vm305_vm4, %v1006_v0, 0.0 }
 0x2e2   : > { %v532_v3 = vsub.f32 %v528_v47, %v531_v1 }
 0x2e3   : > { %905 = vmatmul.mubr.msk.bf16.vlgmr.msra.gmra.mrb[4].mxu0 %vm305_vm4, %v315_v2 }
 0x2e4   : > { %v533_v4 = vmul.f32 1.442695, %v532_v3  ;;  %916 = vmatprep.mubr.msk.bf16.mxu0 %vm1087_vm1, %v1086_v15 }
 0x2e5   : > { %v429_v5 = vpop.permute.xlu0 %428 }
 0x2e6   : > { %1009 = vpow2.f32 %v533_v4  ;;  %v434_v6 = vsel %vm320_vm2, %v429_v5, 0 }
 0x2e7   : > { %915 = vmatpush3.bf16.msra.mxu0 %v434_v6 }
 0x2e8   : > { %v1008_v7 = vpop.eup %1007  ;;  %926 = vmatprep.subr.bf16.mxu0 %v1086_v15 }
 0x2e9   : > { %v423_v9 = vsel %vm305_vm4, %v1008_v7, 0.0  ;;  %v426_v10 = vpack.c.bf16 %v1008_v7, %v1008_v7  ;;  %v869_v7 = vld [vmem:[%s1351_s3] ss:$0 sm:$0xff] }
 0x2ea   : > { %424 = vadd.xlane.f32.xlu0 %v423_v9 }
 0x2eb   : > { %917 = vmatmul.mubr.msk.bf16.vlgmr.msra.gmra.mrb[8].mxu0 %vm305_vm4, %v426_v10 }
 0x2ec   : > { %927 = vmatpush3.bf16.msra.mxu0 %v545_v11  ;;  %928 = vmatprep.mubr.msk.bf16.mxu0 %vm1087_vm1, %v1086_v15 }
 0x2ed   : > { %938 = vmatprep.subr.bf16.mxu0 %v1086_v15 }
 0x2f0   : > { %v1010_v12 = vpop.eup %1009 }
 0x2f1   : > { %v535_v13 = vsel %vm305_vm4, %v1010_v12, 0.0  ;;  %v538_v14 = vpack.c.bf16 %v1010_v12, %v1010_v12 }
 0x2f2   : > { %536 = vadd.xlane.f32.xlu1 %v535_v13 }
 0x2f3   : > { %929 = vmatmul.mubr.msk.bf16.vlgmr.msra.gmra.mrb[12].mxu0 %vm305_vm4, %v538_v14 }
 0x2f4   : > { %940 = vmatprep.mubr.msk.bf16.mxu0 %vm1087_vm1, %v1086_v15 }
 0x306   : > { %v642_v16 = vpop.xlane.xlu1 %641 }
 0x307   : > { %v643_v17 = vsub.f32 %v639_v56, %v642_v16 }
 0x309   : > { %v644_v18 = vmul.f32 1.442695, %v643_v17 }
 0x30a   : > { %v651_v19 = vpop.permute.xlu1 %650 }
 0x30b   : > { %1011 = vpow2.f32 %v644_v18  ;;  %v656_v20 = vsel %vm320_vm2, %v651_v19, 0 }
 0x30c   : > { %939 = vmatpush3.bf16.msra.mxu0 %v656_v20 }
 0x315   : > { %v1012_v21 = vpop.eup %1011 }
 0x316   : > { %v646_v22 = vsel %vm305_vm4, %v1012_v21, 0.0  ;;  %v649_v23 = vpack.c.bf16 %v1012_v21, %v1012_v21 }
 0x317   : > { %647 = vadd.xlane.f32.xlu0 %v646_v22 }
 0x318   : > { %941 = vmatmul.mubr.msk.bf16.vlgmr.msra.gmra.mrb[16].mxu0 %vm305_vm4, %v649_v23 }
 0x31b   : > { %313 = vadd.xlane.f32.xlu0 %v312_v24 }
 0x377   : > { %v425_v25 = vpop.xlane.xlu0 %424 }
 0x378   : > { %1013 = vrcp.f32 %v425_v25 }
 0x37f   : > { %v537_v29 = vpop.xlane.xlu1 %536 }
 0x380   : > { %1015 = vrcp.f32 %v537_v29 }
 0x382   : > { %v1014_v36 = vpop.eup %1013 }
 0x38a   : > { %v1016_v46 = vpop.eup %1015 }
 0x3a4   : > { %v648_v52 = vpop.xlane.xlu0 %647 }
 0x3a5   : > { %1017 = vrcp.f32 %v648_v52 }
 0x3a8   : > { %v314_v61 = vpop.xlane.xlu0 %313 }
 0x3a9   : > { %1019 = vrcp.f32 %v314_v61 }
 0x3af   : > { %v1018_v56 = vpop.eup %1017 }
 0x3b3   : > { %v1020_v62 = vpop.eup %1019 }
 0x3b6   : > { %v358_v26 = vpop.f32.mrb[4].mxu0 }
 0x3b7   : > { %v906_v27 = vpop.f32.mrb[5].mxu0  ;;  %v365_v0 = vmul.f32 %v1020_v62, %v358_v26 }
 0x3b8   : > { %v361_v28 = vpop.f32.mrb[6].mxu0 }
 0x3b9   : > { %v907_v30 = vpop.f32.mrb[7].mxu0 }
 0x3be   : > { %v470_v37 = vpop.f32.mrb[8].mxu0 }
 0x3bf   : > { %v477_v38 = vmul.f32 %v1014_v36, %v470_v37  ;;  %v918_v39 = vpop.f32.mrb[9].mxu0 }
 0x3c0   : > { %v473_v41 = vpop.f32.mrb[10].mxu0 }
 0x3c1   : > { %701 = vrot.lane.b32.xlu1 %v477_v38, %s1092_s9  ;;  %v919_v44 = vpop.f32.mrb[11].mxu0 }
 0x3c6   : > { %v581_v47 = vpop.f32.mrb[12].mxu0 }
 0x3c7   : > { %v588_v48 = vmul.f32 %v1016_v46, %v581_v47  ;;  %v930_v49 = vpop.f32.mrb[13].mxu0 }
 0x3c8   : > { %v584_v50 = vpop.f32.mrb[14].mxu0 }
 0x3c9   : > { %705 = vrot.lane.b32.xlu0 %v588_v48, %s1090_s7  ;;  %v931_v51 = vpop.f32.mrb[15].mxu0  ;;  %s186_s7 = sand.u32 1, %s1075_s16  }
 0x3ca   : > { %s782_s19 = scalar_lea.sflag [#allocation3], %s186_s7 }
 0x3eb   : > { %v692_v57 = vpop.f32.mrb[16].mxu0 }
 0x3ec   : > { %v699_v58 = vmul.f32 %v1018_v56, %v692_v57  ;;  %v942_v59 = vpop.f32.mrb[17].mxu0 }
 0x3ed   : > { %v695_v15 = vpop.f32.mrb[18].mxu0 }
 0x3ee   : > { %709 = vrot.lane.b32.xlu1 %v699_v58, %s1091_s8  ;;  %v943_v60 = vpop.f32.mrb[19].mxu0  ;;  %s858_s8 = sshll.u32 %s186_s7, 3 }
 0x3ef   : > { %s188_s22 = scalar_lea.vmem [#allocation2], %s858_s8 }
 0x3f0   : > { %s795_s23 = sshll.u32 %s188_s22, 4  ;;  %s1307_s23 = int_to_ptr.vmem [resolvable:$true] %s795_s23 }
 0x3f1   : > { %s1021_s30 = scalar_lea.vmem %s1307_s23, 128  ;;  %p1028_p0 = scmp.lt.s32.totalorder %s1307_s23, %s1026_s6 }
 0x3f2   : > { %p1022_p11 = scmp.ne.s32.totalorder %s1307_s23, %s1021_s30  ;;  %p1029_p1 = scmp.lt.s32.totalorder %s1027_s10, %s1021_s30 }
 0x3f4   : > { %p1023_p12 = pnand %p1022_p11, %p1159_p5  ;;  %p1030_p2 = por %p1029_p1, %p1028_p0 }
 0x3f6   : > { %p1024_p13 = pneg %p1023_p12 }
 0x3f8   : > { %p1031_p3 = pnand %p1030_p2, %p1024_p13 }
 0x433   : > { %v702_v63 = vpop.permute.xlu1 %701 }
 0x434   : > { %v712_v2 = vsel %vm257_vm3, %v365_v0, %v702_v63 }
 0x43b   : > { %v706_v1 = vpop.permute.xlu0 %705 }
 0x43c   : > { %v713_v3 = vsel %vm208_vm0, %v712_v2, %v706_v1 }
 0x460   : > { %v710_v4 = vpop.permute.xlu1 %709 }
 0x461   : > { %v715_v5 = vsel %vm714_vm5, %v713_v3, %v710_v4 }
 0x462   : > { %v716_v6 = vpack.c.bf16 %v715_v5, %v715_v5 }
 0x464   : > { %953 = vmatmul.mubr.msk.bf16.vlgmr.msra.gmra.mrb[16].mxu1 %vm736_vm6, %v716_v6 }
 0x537   : > { %v774_v8 = vpop.f32.mrb[16].mxu1 }
 0x538   : > { %v775_v9 = vadd.f32 %v869_v7, %v774_v8  ;;  %v954_v10 = vpop.f32.mrb[17].mxu1 }
 0x539   : > { %v777_v11 = vpop.f32.mrb[18].mxu1 }
 0x53a   : > { %v955_v12 = vpop.f32.mrb[19].mxu1  ;;  %780 = vst.msk [vmem:[%s188_s22] sm:$0xff] %vm208_vm0, %v775_v9 }
 0x53b   : > { %1034 = shalt.err (!%p1031_p3)
}
 0x53c   : > { %s1035_s11 = scalar_lea.hbm %s1305_s29, 128  ;;  %s1039_s7 = scalar_lea.hbm %s1352_s4, 256 }
 0x53d   : > { %p1036_p4 = scmp.ne.s32.totalorder %s1305_s29, %s1035_s11  ;;  %p1040_p9 = scmp.lt.u32.totalorder %s1305_s29, %s1352_s4 }
 0x53e   : > { %p1041_p10 = scmp.lt.u32.totalorder %s1039_s7, %s1035_s11  ;;  %p1043_p12 = scmp.lt.u32.totalorder %s1035_s11, %s1305_s29 }
 0x53f   : > { %p1037_p7 = pnand %p1036_p4, %p1159_p5 }
 0x540   : > { %p1042_p11 = por %p1041_p10, %p1040_p9 }
 0x541   : > { %p1038_p8 = pneg %p1037_p7 }
 0x542   : > { %p1044_p13 = por %p1043_p12, %p1042_p11 }
 0x544   : > { %p1045_p0 = pnand %p1044_p13, %p1038_p8 }
 0x546   : > { %1048 = shalt.err (!%p1045_p0)
}
 0x547   : > { %956 = dma.vmem_to_hbm [thread:$0]  (%p1159_p5), %s1307_s23, 128, %s1305_s29, %s782_s19  }
 0x548 PF: > { %p962_p1 = scmp.ge.s32.totalorder %s1083_s18, 2  ;;  %s807_s14 = sand.u32 1, %s1071_s15  }
 0x549   : > { %s808_s20 = scalar_lea.sflag [#allocation3], %s807_s14 }
 0x54a   : > { %p959_p2 = pnand %p962_p1, %p1163_p6 }
 0x54c   : > { %1066 = dma.done.wait (!%p959_p2), %s808_s20, 128  }
 0x54d   : > { %1068 = vsyncadd (!%p959_p2), %s808_s20, 4294967168  ;;  %p14_p3 = scmp.ge.s32.totalorder %s1146_s21, 4   ;;  %s1355_s15 = smov %s1075_s16 }
 0x54e   : > { %s1356_s16 = smov %s1079_s17  ;;  %s1357_s17 = smov %s1157_s24 }
 0x54f   : > { %s1358_s18 = smov %s1146_s21  ;;  %16 = sbr.rel (!%p14_p3) target bundleno = 3 (0x3), region = 71 }
 0x556   :  { %813 = vsyncpa [#allocation3], 1 }
 0x557   :  { %815 = vsyncpa [#allocation3 + $0x1], 1 }

</bundles_post_ra>
